<compile_context>
chip_gen: v5e
topology: v5e:2x2
jax: 0.10.0
libtpu: 0.0.40
codegen_flags: <defaults>
</compile_context>

<pallas_src>
import math

import numpy as np
import jax
import jax.numpy as jnp
from jax.experimental import pallas as pl
from jax.experimental.pallas import tpu as pltpu


def _sinusoidal_kernel(t_ref, fp_ref, o_ref):
    # t_ref : (tb, 1)   f32 timesteps
    # fp_ref: (2, dim)  f32: row 0 = freq_full, row 1 = phase (0 | pi/2)
    # o_ref : (tb, dim) embeddings; lane j<half -> sin(t*f_j), else cos(t*f_{j-half})
    freq = fp_ref[0:1, :]                       # (1, dim)
    phase = fp_ref[1:2, :]                      # (1, dim)
    # One EUP pass: cos(x) == sin(x + pi/2).  Full-width lane-dense store.
    o_ref[...] = jnp.sin(t_ref[...] * freq + phase).astype(o_ref.dtype)


def _round_down_8(x):
    return max(8, (x // 8) * 8)


def _round_up_8(x):
    return ((x + 7) // 8) * 8


def sinusoidal_position_embeddings(time, dim, *, out_dtype=jnp.float32):
    """Pallas TPU port of SinusoidalPositionEmbeddings.forward.

    time: (B,) timesteps (any real/int dtype).  Returns (B, dim) `out_dtype`
    (float32 by default; pass jnp.bfloat16 if the consumer accepts it — helps
    most on bandwidth-poor v5e since the kernel is store-bound).
    """
    assert dim % 2 == 0 and dim >= 4, "dim must be even and >= 4 (half-1 > 0)"

    time = jnp.asarray(time, jnp.float32)
    (B,) = time.shape
    t2d = time.reshape(B, 1)

    # Host-side constant tables: duplicated freqs + sin/cos phase offsets.
    half = dim // 2
    scale = math.log(10000.0) / (half - 1)
    freqs = np.exp(np.arange(half, dtype=np.float32) * -scale)
    freq_full = np.concatenate([freqs, freqs]).astype(np.float32)           # (dim,)
    phase = np.concatenate(
        [np.zeros(half, np.float32), np.full(half, np.pi / 2, np.float32)])  # (dim,)
    fp = jnp.asarray(np.stack([freq_full, phase]))                           # (2, dim)

    # Row tile: largest that keeps the double-buffered output comfortably inside
    # VMEM (budget chosen to fit v7x's 32 MiB scoped default with headroom).
    out_bytes = jnp.dtype(out_dtype).itemsize
    vmem_budget = 24 * 1024 * 1024
    tb_cap = _round_down_8(min(4096, max(8, vmem_budget // (2 * out_bytes * dim))))

    if B <= tb_cap:
        tb = B          # single full-extent block (exempt from the /8 rule)
    else:
        tb = tb_cap     # multiple of 8; cdiv grid masks the tail

    # Large batches: force >=2 grid steps so both v7x TensorCores contribute
    # store bandwidth (no-op on v5e/v6e; per-step overhead is amortized).
    if B >= 2048:
        tb = min(tb, _round_up_8(pl.cdiv(B, 2)))

    grid = (pl.cdiv(B, tb),)

    cost = pl.CostEstimate(
        flops=2 * B * dim,                         # mul + add
        transcendentals=B * dim,                   # single sin pass
        bytes_accessed=4 * B + 2 * dim * 4 + out_bytes * B * dim,
    )

    return pl.pallas_call(
        _sinusoidal_kernel,
        out_shape=jax.ShapeDtypeStruct((B, dim), out_dtype),
        grid_spec=pltpu.PrefetchScalarGridSpec(
            num_scalar_prefetch=0,
            grid=grid,
            in_specs=[
                pl.BlockSpec((tb, 1), lambda i: (i, 0)),    # timesteps
                pl.BlockSpec((2, dim), lambda i: (0, 0)),   # freq/phase table
            ],
            out_specs=pl.BlockSpec((tb, dim), lambda i: (i, 0)),
        ),
        compiler_params=pltpu.CompilerParams(
            dimension_semantics=("parallel",)),
        cost_estimate=cost,
    )(t2d, fp)


if __name__ == "__main__":
    B, dim = 8, 128   # small: batch of 8 timesteps, 128-dim (lane-dense) embedding

    key = jax.random.PRNGKey(0)
    time = jax.random.uniform(key, (B,), dtype=jnp.float32, minval=0.0, maxval=100.0)

    out = sinusoidal_position_embeddings(time, dim)
    out = jax.block_until_ready(out)

    # pure-JAX reference (mirrors the PyTorch forward exactly)
    half = dim // 2
    emb = math.log(10000.0) / (half - 1)
    freqs = jnp.exp(jnp.arange(half, dtype=jnp.float32) * -emb)
    args = time[:, None] * freqs[None, :]
    ref = jnp.concatenate([jnp.sin(args), jnp.cos(args)], axis=-1)

    assert out.shape == (B, dim)
    assert jnp.allclose(out, ref, atol=1e-4, rtol=1e-4), float(jnp.max(jnp.abs(out - ref)))

    print("KERNEL_OK")
</pallas_src>

<mosaic_0001>
module attributes {stable_mosaic.version = 11 : i64} {
  func.func @_sinusoidal_kernel(%arg0: i32, %arg1: memref<8x1xf32, #tpu.memory_space<vmem>>, %arg2: memref<2x128xf32, #tpu.memory_space<vmem>>, %arg3: memref<8x128xf32, #tpu.memory_space<vmem>>) attributes {dimension_semantics = [#tpu.dimension_semantics<parallel>], iteration_bounds = array<i64: 1>, scalar_prefetch = 0 : i64, scratch_operands = 0 : i64, tpu.core_type = #tpu.core_type<tc>, window_params = [{transform_indices = @transform_0, window_bounds = array<i64: 8, 1>}, {pipeline_mode = #tpu.pipeline_mode<synchronous>, transform_indices = @transform_1, window_bounds = array<i64: 2, 128>}, {transform_indices = @transform_2, window_bounds = array<i64: 8, 128>}]} {
    %c0 = arith.constant 0 : index
    %c0_0 = arith.constant 0 : index
    %0 = vector.load %arg2[%c0, %c0_0] : memref<2x128xf32, #tpu.memory_space<vmem>>, vector<1x128xf32>
    %c1 = arith.constant 1 : index
    %c0_1 = arith.constant 0 : index
    %1 = vector.load %arg2[%c1, %c0_1] : memref<2x128xf32, #tpu.memory_space<vmem>>, vector<1x128xf32>
    %c0_2 = arith.constant 0 : index
    %c0_3 = arith.constant 0 : index
    %2 = vector.load %arg1[%c0_2, %c0_3] : memref<8x1xf32, #tpu.memory_space<vmem>>, vector<8x1xf32>
    %3 = vector.broadcast %2 : vector<8x1xf32> to vector<8x128xf32>
    %4 = vector.broadcast %0 : vector<1x128xf32> to vector<8x128xf32>
    %5 = arith.mulf %3, %4 : vector<8x128xf32>
    %6 = vector.broadcast %1 : vector<1x128xf32> to vector<8x128xf32>
    %7 = arith.addf %5, %6 : vector<8x128xf32>
    %8 = math.sin %7 : vector<8x128xf32>
    %c0_4 = arith.constant 0 : index
    %c0_5 = arith.constant 0 : index
    %9 = vector.load %arg3[%c0_4, %c0_5] : memref<8x128xf32, #tpu.memory_space<vmem>>, vector<8x128xf32>
    tpu.vector_store %arg3[%c0_4, %c0_5], %8 {strides = array<i32>} : memref<8x128xf32, #tpu.memory_space<vmem>>, vector<8x128xf32>,
    return
  }
  func.func @transform_0(%arg0: i32) -> (i32, i32) {
    %c0_i32 = arith.constant 0 : i32
    %c0_i32_0 = arith.constant 0 : i32
    return %arg0, %c0_i32 : i32, i32
  }
  func.func @transform_1(%arg0: i32) -> (i32, i32) {
    %c0_i32 = arith.constant 0 : i32
    %c0_i32_0 = arith.constant 0 : i32
    %c0_i32_1 = arith.constant 0 : i32
    return %c0_i32, %c0_i32_0 : i32, i32
  }
  func.func @transform_2(%arg0: i32) -> (i32, i32) {
    %c0_i32 = arith.constant 0 : i32
    %c0_i32_0 = arith.constant 0 : i32
    return %arg0, %c0_i32 : i32, i32
  }
}

</mosaic_0001>

<bundles_post_ra>
// kernel: tpu_custom_call.1
= control target key start
LH: loop header
LB: loop body
LE: loop exit
PB: predicated region body
PF: predicated region fallthrough
CT: control target
= control target key end

     0   :  { %v236_v1 = vmov 0   ;;  %s322_s0 = inlined_call_operand.vmem [shape: f32[8,1], index: 0, kind: input, shape index: {}]   ;;  %s323_s1 = inlined_call_operand.vmem [shape: f32[2,128], index: 1, kind: input, shape index: {}]   ;;  %s324_s2 = inlined_call_operand.hbm [shape: f32[8,128], index: 2, kind: output, shape index: {}]  }
   0x1   :  { %v14_v0 = vld [vmem:[%s322_s0] sm:$0xff]  ;;  %207 = vset.pattern.permute.xlu0 %v236_v1 }
   0x2   :  { %17 = vperm.xlu0 %207, %v14_v0  }
   0x3   :  { %7 = vsyncpa [#allocation3], 0  ;;  %v208_v2 = vld [vmem:[%s323_s1] ss:$0 sm:$0xff]  ;;  %v209_v3 = vld [vmem:[%s323_s1 + $0x1] ss:$0 sm:$0xff] }
   0x4   :  { %v237_v18 = vmov 683565275   ;;  %v238_v20 = vmov 2475754826   ;;  %v239_v22 = vmov 2131351028  }
   0x5   :  { %v240_v24 = vmov 2102212464   ;;  %v241_v29 = vmov 920167782   ;;  %v242_v32 = vmov 1326507024  }
   0x6   :  { %s243_s0 = smov [#allocation2]   ;;  %s187_s17 = sshll.u32 %s324_s2, 4  ;;  %s188_s17 = int_to_ptr.hbm [resolvable:$true] %s187_s17 }
   0x7   :  { %s185_s1 = sshll.u32 %s243_s0, 4  ;;  %s186_s1 = int_to_ptr.vmem [resolvable:$true] %s185_s1 }
  0x74   :  { %v18_v4 = vpop.permute.xlu0 %17 }
  0x75   :  { %v21_v5 = vmul.f32 %v208_v2, %v18_v4 }
  0x77   :  { %v269_v6 = vadd.f32 %v209_v3, %v21_v5 }
  0x79   :  { %v27_v7 = vand.u32 2139095040, %v269_v6  ;;  %v24_v9 = vand.u32 2147483647, %v269_v6  ;;  %vm26_vm12 = vcmp.lt.s32.totalorder %v269_v6, 0 }
  0x7b   :  { %v28_v8 = vshrl.u32 %v27_v7, 23  ;;  %v31_v12 = vand.u32 8388607, %v24_v9  ;;  %vm25_vm13 = vcmp.le.f32.partialorder %v24_v9, 0.7853982 }
  0x7d   :  { %v196_v10 = vadd.s32 4294967169, %v28_v8  ;;  %v32_v15 = vor.u32 8388608, %v31_v12 }
  0x7f   :  { %v34_v11 = vadd.s32 1, %v196_v10  ;;  %v277_v34 = vshll.u32 %v32_v15, 8 }
  0x81   :  { %vm35_vm0 = vcmp.gt.s32.totalorder %v34_v11, 0  ;;  %v73_v46 = vand.u32 65535, %v277_v34  ;;  %v74_v48 = vshrl.u32 %v277_v34, 16 }
  0x82   :  { %v36_v13 = vsel %vm35_vm0, %v34_v11, 0 }
  0x83   :  { %v38_v14 = vand.u32 31, %v36_v13  ;;  %v275_v16 = vshrl.u32 %v36_v13, 5 }
  0x85   :  { %v39_v17 = vsub.s32 32, %v38_v14  ;;  %v41_v19 = vshll.u32 %v237_v18, %v38_v14  ;;  %v44_v21 = vshll.u32 %v238_v20, %v38_v14  ;;  %v47_v23 = vshll.u32 %v239_v22, %v38_v14 }
  0x86   :  { %v50_v25 = vshll.u32 %v240_v24, %v38_v14  ;;  %v53_v31 = vshll.u32 %v241_v29, %v38_v14  ;;  %vm56_vm1 = vcmp.lt.s32.totalorder %v275_v16, 1  ;;  %vm59_vm2 = vcmp.lt.s32.totalorder %v275_v16, 4 }
  0x87   :  { %v42_v26 = vshrl.u32 %v238_v20, %v39_v17  ;;  %v45_v27 = vshrl.u32 %v239_v22, %v39_v17  ;;  %v48_v28 = vshrl.u32 %v240_v24, %v39_v17  ;;  %v51_v30 = vshrl.u32 %v241_v29, %v39_v17 }
  0x88   :  { %v54_v33 = vshrl.u32 %v242_v32, %v39_v17  ;;  %vm58_vm3 = vcmp.lt.s32.totalorder %v275_v16, 3  ;;  %vm57_vm4 = vcmp.lt.s32.totalorder %v275_v16, 2  ;;  %v40_v11 = vshrl.u32 %v237_v18, %v39_v17 }
  0x89   :  { %v43_v35 = vor.u32 %v42_v26, %v41_v19  ;;  %v46_v36 = vor.u32 %v45_v27, %v44_v21  ;;  %v49_v37 = vor.u32 %v48_v28, %v47_v23  ;;  %v52_v38 = vor.u32 %v51_v30, %v50_v25 }
  0x8a   :  { %v55_v39 = vor.u32 %v54_v33, %v53_v31 }
  0x8b   :  { %v64_v40 = vsel %vm56_vm1, %v43_v35, %v46_v36  ;;  %v65_v41 = vsel %vm59_vm2, %v52_v38, 920167782  ;;  %v68_v42 = vsel %vm56_vm1, %v46_v36, %v49_v37  ;;  %v61_v7 = vsel %vm59_vm2, %v49_v37, 2102212464 }
  0x8c   :  { %v66_v43 = vsel %vm58_vm3, %v49_v37, %v65_v41  ;;  %v69_v44 = vsel %vm59_vm2, %v55_v39, 1326507024  ;;  %v60_v20 = vsel %vm56_vm1, %v40_v11, %v43_v35  ;;  %v62_v21 = vsel %vm58_vm3, %v46_v36, %v61_v7 }
  0x8d   :  { %v70_v45 = vsel %vm58_vm3, %v52_v38, %v69_v44  ;;  %v67_v47 = vsel %vm57_vm4, %v64_v40, %v66_v43  ;;  %v63_v18 = vsel %vm57_vm4, %v60_v20, %v62_v21  ;;  %vm167_vm1 = vweird.f32 %v269_v6 }
  0x8e   :  { %v71_v49 = vsel %vm57_vm4, %v68_v42, %v70_v45  ;;  %v97_v50 = vand.u32 65535, %v67_v47  ;;  %v98_v51 = vshrl.u32 %v67_v47, 16  ;;  %v117_v30 = vmul.u32 %v277_v34, %v63_v18 }
  0x8f   :  { %v75_v52 = vand.u32 65535, %v71_v49  ;;  %v76_v53 = vshrl.u32 %v71_v49, 16 }
  0x90   :  { %v100_v54 = vmul.u32 %v98_v51, %v73_v46  ;;  %v101_v55 = vmul.u32 %v97_v50, %v74_v48  ;;  %v99_v58 = vmul.u32 %v97_v50, %v73_v46  ;;  %v102_v62 = vmul.u32 %v98_v51, %v74_v48 }
  0x91   :  { %v78_v56 = vmul.u32 %v76_v53, %v73_v46  ;;  %v79_v57 = vmul.u32 %v75_v52, %v74_v48  ;;  %v77_v60 = vmul.u32 %v75_v52, %v73_v46  ;;  %v80_v63 = vmul.u32 %v76_v53, %v74_v48 }
  0x92   :  { %v103_v59 = vshll.u32 %v100_v54, 16  ;;  %v105_v0 = vshll.u32 %v101_v55, 16  ;;  %v104_v15 = vshrl.u32 %v100_v54, 16  ;;  %v106_v24 = vshrl.u32 %v101_v55, 16 }
  0x93   :  { %v81_v61 = vshll.u32 %v78_v56, 16  ;;  %v83_v3 = vshll.u32 %v79_v57, 16  ;;  %v82_v22 = vshrl.u32 %v78_v56, 16  ;;  %v84_v26 = vshrl.u32 %v79_v57, 16 }
  0x94   :  { %vm107_vm5 = vc.u32 %v99_v58, %v103_v59  ;;  %v109_v2 = vadd.s32 %v103_v59, %v99_v58 }
  0x95   :  { %vm85_vm6 = vc.u32 %v77_v60, %v81_v61  ;;  %v87_v4 = vadd.s32 %v81_v61, %v77_v60  ;;  %v108_v5 = vsel %vm107_vm5, 1, %v236_v1 }
  0x96   :  { %v86_v8 = vsel %vm85_vm6, 1, %v236_v1  ;;  %v110_v10 = vadd.s32 %v108_v5, %v102_v62  ;;  %vm111_vm7 = vc.u32 %v109_v2, %v105_v0 }
  0x97   :  { %v88_v12 = vadd.s32 %v86_v8, %v80_v63  ;;  %vm89_vm8 = vc.u32 %v87_v4, %v83_v3  ;;  %v112_v13 = vsel %vm111_vm7, 1, %v236_v1 }
  0x98   :  { %v90_v14 = vsel %vm89_vm8, 1, %v236_v1  ;;  %v114_v19 = vadd.s32 %v112_v13, %v110_v10  ;;  %v113_v1 = vadd.s32 %v109_v2, %v105_v0 }
  0x99   :  { %v92_v23 = vadd.s32 %v90_v14, %v88_v12 }
  0x9a   :  { %v115_v25 = vadd.s32 %v114_v19, %v104_v15 }
  0x9b   :  { %v93_v17 = vadd.s32 %v92_v23, %v82_v22 }
  0x9c   :  { %v116_v27 = vadd.s32 %v115_v25, %v106_v24 }
  0x9d   :  { %v94_v28 = vadd.s32 %v93_v17, %v84_v26 }
  0x9e   :  { %v120_v29 = vadd.s32 1, %v116_v27 }
  0x9f   :  { %vm119_vm9 = vc.u32 %v94_v28, %v113_v1  ;;  %v118_v42 = vadd.s32 %v113_v1, %v94_v28 }
  0xa0   :  { %v121_v31 = vsel %vm119_vm9, %v120_v29, %v116_v27 }
  0xa1   :  { %v122_v32 = vadd.s32 %v121_v31, %v117_v30 }
  0xa3   :  { %v123_v33 = vadd.s32 536870912, %v122_v32 }
  0xa5   :  { %v124_v35 = vshrl.u32 %v123_v33, 30 }
  0xa7   :  { %v125_v36 = vshll.u32 %v124_v35, 30  ;;  %v148_v55 = vsub.s32 4, %v124_v35 }
  0xa9   :  { %v126_v37 = vsub.s32 %v122_v32, %v125_v36  ;;  %v149_v60 = vsel %vm26_vm12, %v148_v55, %v124_v35 }
  0xaa   :  { %v151_v63 = vsel %vm25_vm13, 0, %v149_v60 }
  0xab   :  { %vm127_vm10 = vcmp.lt.s32.totalorder %v126_v37, 0  ;;  %v128_v38 = vsub.s32 0, %v126_v37  ;;  %v168_v5 = vadd.s32 3, %v151_v63 }
  0xad   :  { %v129_v39 = vsel %vm127_vm10, %v128_v38, %v126_v37  ;;  %v169_v11 = vand.u32 3, %v168_v5 }
  0xae   :  { %v130_v40 = vclz %v129_v39 }
  0xaf   :  { %vm171_vm14 = vcmp.eq.s32.totalorder %v169_v11, 0  ;;  %vm174_vm15 = vcmp.eq.s32.totalorder %v169_v11, 2  ;;  %vm170_vm0 = vcmp.lt.s32.totalorder %v169_v11, 2 }
  0xb0   :  { %v197_v41 = vadd.s32 4294967294, %v130_v40 }
  0xb2   :  { %vm198_vm11 = vcmp.lt.s32.totalorder %v197_v41, 0 }
  0xb3   :  { %v133_v16 = vsel %vm198_vm11, 0, %v197_v41 }
  0xb4   :  { %v134_v43 = vsub.s32 32, %v133_v16  ;;  %v138_v44 = vsub.s32 4294967266, %v133_v16  ;;  %v135_v45 = vshll.u32 %v126_v37, %v133_v16 }
  0xb6   :  { %v136_v46 = vshrl.u32 %v118_v42, %v134_v43  ;;  %v139_v34 = vadd.s32 127, %v138_v44 }
  0xb8   :  { %v137_v47 = vor.u32 %v136_v46, %v135_v45  ;;  %v140_v48 = vshll.u32 %v139_v34, 23 }
  0xba   :  { %v141_v49 = vor.u32 4788187, %v140_v48  ;;  %v144_v51 = vcvt.s32.f32 %v137_v47 }
  0xbc   :  { %v142_v50 = vand.u32 2147483647, %v141_v49 }
  0xbe   :  { %v145_v52 = vmul.f32 %v144_v51, %v142_v50 }
  0xc0   :  { %v146_v53 = vxor.u32 2147483648, %v145_v52 }
  0xc2   :  { %v147_v54 = vsel %vm26_vm12, %v146_v53, %v145_v52 }
  0xc3   :  { %v150_v56 = vsel %vm25_vm13, %v269_v6, %v147_v54 }
  0xc4   :  { %v152_v57 = vmul.f32 %v150_v56, %v150_v56 }
  0xc6   :  { %v153_v58 = vmul.f32 -0.001358992, %v152_v57  ;;  %v160_v59 = vmul.f32 -0.00019511016, %v152_v57 }
  0xc8   :  { %v154_v61 = vadd.f32 0.041655596, %v153_v58  ;;  %v161_v62 = vadd.f32 0.008332121, %v160_v59 }
  0xca   :  { %v155_v0 = vmul.f32 %v154_v61, %v152_v57  ;;  %v162_v2 = vmul.f32 %v161_v62, %v152_v57 }
  0xcc   :  { %v156_v3 = vadd.f32 -0.4999988, %v155_v0  ;;  %v163_v4 = vadd.f32 -0.16666654, %v162_v2 }
  0xce   :  { %v157_v7 = vmul.f32 %v156_v3, %v152_v57  ;;  %v164_v8 = vmul.f32 %v163_v4, %v152_v57 }
  0xd0   :  { %v158_v10 = vadd.f32 1.0, %v157_v7  ;;  %v165_v9 = vadd.f32 1.0, %v164_v8 }
  0xd2   :  { %v166_v12 = vmul.f32 %v165_v9, %v150_v56  ;;  %v175_v13 = vxor.u32 2147483648, %v158_v10 }
  0xd4   :  { %v172_v14 = vxor.u32 2147483648, %v166_v12  ;;  %v176_v19 = vsel %vm174_vm15, %v175_v13, %v166_v12 }
  0xd6   :  { %v173_v15 = vsel %vm171_vm14, %v158_v10, %v172_v14 }
  0xd7   :  { %v177_v20 = vsel %vm170_vm0, %v173_v15, %v176_v19 }
  0xd8   :  { %v178_v21 = vsel %vm167_vm1, nan, %v177_v20 }
  0xd9   :  { %179 = vst [vmem:[#allocation2] sm:$0xff] %v178_v21 }
  0xda   :  { %190 = dma.vmem_to_hbm [thread:$0]  %s186_s1, 128, %s188_s17, [#allocation3]  }
  0xdb   :  { %234 = dma.done.wait [#allocation3], 128  }
  0xdc   :  { %235 = vsyncadd [#allocation3], 4294967168 }
  0xdd   :  { %195 = vsyncpa [#allocation3], 1 }

</bundles_post_ra>
